<compile_context>
chip_gen: v6e
topology: v6e:2x2x1
jax: 0.10.0
libtpu: 0.0.40
codegen_flags: <defaults>
</compile_context>

<pallas_src>
import jax
import jax.numpy as jnp
from jax import lax
from jax.experimental import pallas as pl
from jax.experimental.pallas import tpu as pltpu

HIDDEN = 16
LANES = 128
CHUNK_ROWS = 128          # rows per inner strip: 16 vregs per live f32 value


def _make_kernel(tile_rows: int, chunk: int):
    assert tile_rows % chunk == 0
    n_chunks = tile_rows // chunk

    def kernel(x_ref, coef_ref, o_ref):
        # x_ref / o_ref: (tile_rows, 128) f32 in VMEM (lane-dense batch).
        # coef_ref: (2 + 2*HIDDEN,) f32 in SMEM = [A, C, e_0..e_15, t_0..t_15].
        a = coef_ref[0]
        c = coef_ref[1]
        es = [coef_ref[2 + k] for k in range(HIDDEN)]
        ts = [coef_ref[2 + HIDDEN + k] for k in range(HIDDEN)]

        def body(i, carry):
            r = pl.multiple_of(i * chunk, chunk)
            xs = x_ref[pl.ds(r, chunk), :]
            acc = xs * a + c                          # A*x + C (b2 folded into C)
            for k in range(HIDDEN):                   # unrolled: add, abs, mul, add
                acc = acc + es[k] * jnp.abs(xs + ts[k])
            # sigmoid(y) = 1 / (1 + exp(-y)); exp and approx reciprocal -> EUP slot.
            o_ref[pl.ds(r, chunk), :] = pl.reciprocal(1.0 + jnp.exp(-acc), approx=True)
            return carry

        lax.fori_loop(0, n_chunks, body, 0, unroll=False)

    return kernel


def _fold_params(w1, b1, w2, b2):
    """Fold fc1/relu/fc2/biases into y = A*x + C + sum_k e_k*|x + t_k| coefficients."""
    w1 = w1.astype(jnp.float32)
    b1 = b1.astype(jnp.float32)
    w2 = w2.astype(jnp.float32)
    b2 = b2.astype(jnp.float32)
    nz = w1 != 0.0
    a = 0.5 * jnp.sum(jnp.where(nz, w1 * w2, 0.0))
    c = b2[0] + jnp.sum(jnp.where(nz, 0.5 * b1 * w2, jnp.maximum(b1, 0.0) * w2))
    e = jnp.where(nz, 0.5 * w2 * jnp.abs(w1), 0.0)
    t = jnp.where(nz, b1 / jnp.where(nz, w1, 1.0), 0.0)
    return jnp.concatenate([jnp.stack([a, c]), e, t])   # (2 + 2*HIDDEN,)


def even_odd_forward(x, w1, b1, w2, b2, *, tile_rows=2048):
    """x: (B, 1) f32. w1, b1, w2: (16,) f32; b2: (1,) f32. Returns (B, 1) f32.

    w1 == fc1.weight.reshape(16)  (fc1.weight is (16, 1))
    b1 == fc1.bias                (16,)
    w2 == fc2.weight.reshape(16)  (fc2.weight is (1, 16))
    b2 == fc2.bias                (1,)
    """
    B = x.shape[0]
    rows = -(-B // LANES)                       # number of 128-lane rows

    # Row tile: multiple of 8, capped by tile_rows and by round_up(cdiv(rows,2), 8)
    # so the parallel grid has >= 2 steps when possible (both v7x TCs busy).
    if rows <= 8:
        tr = 8
    else:
        cap = ((-(-rows // 2) + 7) // 8) * 8
        tr = min(tile_rows, cap)
        tr = ((tr + 7) // 8) * 8
        if tr >= CHUNK_ROWS:
            tr = (tr // CHUNK_ROWS) * CHUNK_ROWS   # strip-mine chunks divide evenly
    chunk = min(CHUNK_ROWS, tr)

    # Lane-dense input: pad only the final partial 128-lane row (<= 127 elements).
    x_flat = x.reshape(-1).astype(jnp.float32)
    pad = rows * LANES - B
    if pad:
        x_flat = jnp.pad(x_flat, (0, pad))
    x2d = x_flat.reshape(rows, LANES)

    coef = _fold_params(w1, b1, w2, b2)

    grid = (pl.cdiv(rows, tr),)                 # partial last block handled by Pallas

    out2d = pl.pallas_call(
        _make_kernel(tr, chunk),
        out_shape=jax.ShapeDtypeStruct((rows, LANES), jnp.float32),
        grid_spec=pltpu.PrefetchScalarGridSpec(
            num_scalar_prefetch=0,
            grid=grid,
            in_specs=[
                pl.BlockSpec((tr, LANES), lambda i: (i, 0)),        # x tile (lane-dense)
                pl.BlockSpec(memory_space=pltpu.MemorySpace.SMEM),  # folded coefficients
            ],
            out_specs=pl.BlockSpec((tr, LANES), lambda i: (i, 0)),
        ),
        compiler_params=pltpu.CompilerParams(
            dimension_semantics=("parallel",),
        ),
    )(x2d, coef)

    # Slice off the lane pad; callers that can consume the (rows, 128) lane-dense
    # layout directly can skip this reshape/slice pass.
    return out2d.reshape(-1)[:B].reshape(B, 1)


def init_params(key):
    # Shapes mimic nn.Linear(1,16) / nn.Linear(16,1), flattened on the size-1 dims.
    k1, k2, k3, k4 = jax.random.split(key, 4)
    w1 = jax.random.uniform(k1, (HIDDEN,), jnp.float32, -1.0, 1.0)
    b1 = jax.random.uniform(k2, (HIDDEN,), jnp.float32, -1.0, 1.0)
    w2 = jax.random.uniform(k3, (HIDDEN,), jnp.float32, -0.25, 0.25)
    b2 = jax.random.uniform(k4, (1,), jnp.float32, -0.25, 0.25)
    return w1, b1, w2, b2


if __name__ == "__main__":
    key = jax.random.PRNGKey(0)
    k_x, k_p = jax.random.split(key)
    w1, b1, w2, b2 = init_params(k_p)

    # Batches chosen to exercise: tail pad + partial single block (300),
    # multi-step parallel grid + partial last block (3000),
    # 128-row strip-mined chunks (40000). All tiny / fast.
    for B in (300, 3000, 40000):
        x = jax.random.uniform(jax.random.fold_in(k_x, B), (B, 1), jnp.float32, 0.0, 10.0)
        out = jax.block_until_ready(even_odd_forward(x, w1, b1, w2, b2))

        # Reference in plain JAX (same math as the PyTorch module).
        ref = jax.nn.sigmoid(
            jnp.maximum(x @ w1[None, :] + b1[None, :], 0.0) @ w2[:, None] + b2[None, :]
        )
        assert out.shape == (B, 1)
        # Tolerance loosened vs v1: approx EUP reciprocal in the sigmoid (~1e-4 rel err).
        err = float(jnp.max(jnp.abs(out - ref)))
        assert jnp.allclose(out, ref, atol=2e-3, rtol=2e-3), (B, err)

    print("KERNEL_OK")
</pallas_src>

<mosaic_0001>
module attributes {stable_mosaic.version = 11 : i64} {
  func.func @kernel(%arg0: i32, %arg1: memref<8x128xf32, #tpu.memory_space<vmem>>, %arg2: memref<34xf32, #tpu.memory_space<smem>>, %arg3: memref<8x128xf32, #tpu.memory_space<vmem>>) attributes {dimension_semantics = [#tpu.dimension_semantics<parallel>], iteration_bounds = array<i64: 1>, scalar_prefetch = 0 : i64, scratch_operands = 0 : i64, tpu.core_type = #tpu.core_type<tc>, window_params = [{transform_indices = @transform_0, window_bounds = array<i64: 8, 128>}, {transform_indices = @transform_1, window_bounds = array<i64: 34>}, {transform_indices = @transform_2, window_bounds = array<i64: 8, 128>}]} {
    %c0 = arith.constant 0 : index
    %0 = memref.load %arg2[%c0] : memref<34xf32, #tpu.memory_space<smem>>
    %c1 = arith.constant 1 : index
    %1 = memref.load %arg2[%c1] : memref<34xf32, #tpu.memory_space<smem>>
    %c2 = arith.constant 2 : index
    %2 = memref.load %arg2[%c2] : memref<34xf32, #tpu.memory_space<smem>>
    %c3 = arith.constant 3 : index
    %3 = memref.load %arg2[%c3] : memref<34xf32, #tpu.memory_space<smem>>
    %c4 = arith.constant 4 : index
    %4 = memref.load %arg2[%c4] : memref<34xf32, #tpu.memory_space<smem>>
    %c5 = arith.constant 5 : index
    %5 = memref.load %arg2[%c5] : memref<34xf32, #tpu.memory_space<smem>>
    %c6 = arith.constant 6 : index
    %6 = memref.load %arg2[%c6] : memref<34xf32, #tpu.memory_space<smem>>
    %c7 = arith.constant 7 : index
    %7 = memref.load %arg2[%c7] : memref<34xf32, #tpu.memory_space<smem>>
    %c8 = arith.constant 8 : index
    %8 = memref.load %arg2[%c8] : memref<34xf32, #tpu.memory_space<smem>>
    %c9 = arith.constant 9 : index
    %9 = memref.load %arg2[%c9] : memref<34xf32, #tpu.memory_space<smem>>
    %c10 = arith.constant 10 : index
    %10 = memref.load %arg2[%c10] : memref<34xf32, #tpu.memory_space<smem>>
    %c11 = arith.constant 11 : index
    %11 = memref.load %arg2[%c11] : memref<34xf32, #tpu.memory_space<smem>>
    %c12 = arith.constant 12 : index
    %12 = memref.load %arg2[%c12] : memref<34xf32, #tpu.memory_space<smem>>
    %c13 = arith.constant 13 : index
    %13 = memref.load %arg2[%c13] : memref<34xf32, #tpu.memory_space<smem>>
    %c14 = arith.constant 14 : index
    %14 = memref.load %arg2[%c14] : memref<34xf32, #tpu.memory_space<smem>>
    %c15 = arith.constant 15 : index
    %15 = memref.load %arg2[%c15] : memref<34xf32, #tpu.memory_space<smem>>
    %c16 = arith.constant 16 : index
    %16 = memref.load %arg2[%c16] : memref<34xf32, #tpu.memory_space<smem>>
    %c17 = arith.constant 17 : index
    %17 = memref.load %arg2[%c17] : memref<34xf32, #tpu.memory_space<smem>>
    %c18 = arith.constant 18 : index
    %18 = memref.load %arg2[%c18] : memref<34xf32, #tpu.memory_space<smem>>
    %c19 = arith.constant 19 : index
    %19 = memref.load %arg2[%c19] : memref<34xf32, #tpu.memory_space<smem>>
    %c20 = arith.constant 20 : index
    %20 = memref.load %arg2[%c20] : memref<34xf32, #tpu.memory_space<smem>>
    %c21 = arith.constant 21 : index
    %21 = memref.load %arg2[%c21] : memref<34xf32, #tpu.memory_space<smem>>
    %c22 = arith.constant 22 : index
    %22 = memref.load %arg2[%c22] : memref<34xf32, #tpu.memory_space<smem>>
    %c23 = arith.constant 23 : index
    %23 = memref.load %arg2[%c23] : memref<34xf32, #tpu.memory_space<smem>>
    %c24 = arith.constant 24 : index
    %24 = memref.load %arg2[%c24] : memref<34xf32, #tpu.memory_space<smem>>
    %c25 = arith.constant 25 : index
    %25 = memref.load %arg2[%c25] : memref<34xf32, #tpu.memory_space<smem>>
    %c26 = arith.constant 26 : index
    %26 = memref.load %arg2[%c26] : memref<34xf32, #tpu.memory_space<smem>>
    %c27 = arith.constant 27 : index
    %27 = memref.load %arg2[%c27] : memref<34xf32, #tpu.memory_space<smem>>
    %c28 = arith.constant 28 : index
    %28 = memref.load %arg2[%c28] : memref<34xf32, #tpu.memory_space<smem>>
    %c29 = arith.constant 29 : index
    %29 = memref.load %arg2[%c29] : memref<34xf32, #tpu.memory_space<smem>>
    %c30 = arith.constant 30 : index
    %30 = memref.load %arg2[%c30] : memref<34xf32, #tpu.memory_space<smem>>
    %c31 = arith.constant 31 : index
    %31 = memref.load %arg2[%c31] : memref<34xf32, #tpu.memory_space<smem>>
    %c32 = arith.constant 32 : index
    %32 = memref.load %arg2[%c32] : memref<34xf32, #tpu.memory_space<smem>>
    %c33 = arith.constant 33 : index
    %33 = memref.load %arg2[%c33] : memref<34xf32, #tpu.memory_space<smem>>
    %c0_i32 = arith.constant 0 : i32
    %c8_i32 = arith.constant 8 : i32
    %34 = arith.muli %c0_i32, %c8_i32 : i32
    %35 = tpu.assume_multiple %34, 8 : i32
    %36 = arith.index_cast %35 : i32 to index
    %c0_0 = arith.constant 0 : index
    %37 = vector.load %arg1[%36, %c0_0] : memref<8x128xf32, #tpu.memory_space<vmem>>, vector<8x128xf32>
    %38 = vector.broadcast %0 : f32 to vector<8x128xf32>
    %39 = arith.mulf %37, %38 : vector<8x128xf32>
    %40 = vector.broadcast %1 : f32 to vector<8x128xf32>
    %41 = arith.addf %39, %40 : vector<8x128xf32>
    %42 = vector.broadcast %18 : f32 to vector<8x128xf32>
    %43 = arith.addf %37, %42 : vector<8x128xf32>
    %44 = math.absf %43 : vector<8x128xf32>
    %45 = vector.broadcast %2 : f32 to vector<8x128xf32>
    %46 = arith.mulf %45, %44 : vector<8x128xf32>
    %47 = arith.addf %41, %46 : vector<8x128xf32>
    %48 = vector.broadcast %19 : f32 to vector<8x128xf32>
    %49 = arith.addf %37, %48 : vector<8x128xf32>
    %50 = math.absf %49 : vector<8x128xf32>
    %51 = vector.broadcast %3 : f32 to vector<8x128xf32>
    %52 = arith.mulf %51, %50 : vector<8x128xf32>
    %53 = arith.addf %47, %52 : vector<8x128xf32>
    %54 = vector.broadcast %20 : f32 to vector<8x128xf32>
    %55 = arith.addf %37, %54 : vector<8x128xf32>
    %56 = math.absf %55 : vector<8x128xf32>
    %57 = vector.broadcast %4 : f32 to vector<8x128xf32>
    %58 = arith.mulf %57, %56 : vector<8x128xf32>
    %59 = arith.addf %53, %58 : vector<8x128xf32>
    %60 = vector.broadcast %21 : f32 to vector<8x128xf32>
    %61 = arith.addf %37, %60 : vector<8x128xf32>
    %62 = math.absf %61 : vector<8x128xf32>
    %63 = vector.broadcast %5 : f32 to vector<8x128xf32>
    %64 = arith.mulf %63, %62 : vector<8x128xf32>
    %65 = arith.addf %59, %64 : vector<8x128xf32>
    %66 = vector.broadcast %22 : f32 to vector<8x128xf32>
    %67 = arith.addf %37, %66 : vector<8x128xf32>
    %68 = math.absf %67 : vector<8x128xf32>
    %69 = vector.broadcast %6 : f32 to vector<8x128xf32>
    %70 = arith.mulf %69, %68 : vector<8x128xf32>
    %71 = arith.addf %65, %70 : vector<8x128xf32>
    %72 = vector.broadcast %23 : f32 to vector<8x128xf32>
    %73 = arith.addf %37, %72 : vector<8x128xf32>
    %74 = math.absf %73 : vector<8x128xf32>
    %75 = vector.broadcast %7 : f32 to vector<8x128xf32>
    %76 = arith.mulf %75, %74 : vector<8x128xf32>
    %77 = arith.addf %71, %76 : vector<8x128xf32>
    %78 = vector.broadcast %24 : f32 to vector<8x128xf32>
    %79 = arith.addf %37, %78 : vector<8x128xf32>
    %80 = math.absf %79 : vector<8x128xf32>
    %81 = vector.broadcast %8 : f32 to vector<8x128xf32>
    %82 = arith.mulf %81, %80 : vector<8x128xf32>
    %83 = arith.addf %77, %82 : vector<8x128xf32>
    %84 = vector.broadcast %25 : f32 to vector<8x128xf32>
    %85 = arith.addf %37, %84 : vector<8x128xf32>
    %86 = math.absf %85 : vector<8x128xf32>
    %87 = vector.broadcast %9 : f32 to vector<8x128xf32>
    %88 = arith.mulf %87, %86 : vector<8x128xf32>
    %89 = arith.addf %83, %88 : vector<8x128xf32>
    %90 = vector.broadcast %26 : f32 to vector<8x128xf32>
    %91 = arith.addf %37, %90 : vector<8x128xf32>
    %92 = math.absf %91 : vector<8x128xf32>
    %93 = vector.broadcast %10 : f32 to vector<8x128xf32>
    %94 = arith.mulf %93, %92 : vector<8x128xf32>
    %95 = arith.addf %89, %94 : vector<8x128xf32>
    %96 = vector.broadcast %27 : f32 to vector<8x128xf32>
    %97 = arith.addf %37, %96 : vector<8x128xf32>
    %98 = math.absf %97 : vector<8x128xf32>
    %99 = vector.broadcast %11 : f32 to vector<8x128xf32>
    %100 = arith.mulf %99, %98 : vector<8x128xf32>
    %101 = arith.addf %95, %100 : vector<8x128xf32>
    %102 = vector.broadcast %28 : f32 to vector<8x128xf32>
    %103 = arith.addf %37, %102 : vector<8x128xf32>
    %104 = math.absf %103 : vector<8x128xf32>
    %105 = vector.broadcast %12 : f32 to vector<8x128xf32>
    %106 = arith.mulf %105, %104 : vector<8x128xf32>
    %107 = arith.addf %101, %106 : vector<8x128xf32>
    %108 = vector.broadcast %29 : f32 to vector<8x128xf32>
    %109 = arith.addf %37, %108 : vector<8x128xf32>
    %110 = math.absf %109 : vector<8x128xf32>
    %111 = vector.broadcast %13 : f32 to vector<8x128xf32>
    %112 = arith.mulf %111, %110 : vector<8x128xf32>
    %113 = arith.addf %107, %112 : vector<8x128xf32>
    %114 = vector.broadcast %30 : f32 to vector<8x128xf32>
    %115 = arith.addf %37, %114 : vector<8x128xf32>
    %116 = math.absf %115 : vector<8x128xf32>
    %117 = vector.broadcast %14 : f32 to vector<8x128xf32>
    %118 = arith.mulf %117, %116 : vector<8x128xf32>
    %119 = arith.addf %113, %118 : vector<8x128xf32>
    %120 = vector.broadcast %31 : f32 to vector<8x128xf32>
    %121 = arith.addf %37, %120 : vector<8x128xf32>
    %122 = math.absf %121 : vector<8x128xf32>
    %123 = vector.broadcast %15 : f32 to vector<8x128xf32>
    %124 = arith.mulf %123, %122 : vector<8x128xf32>
    %125 = arith.addf %119, %124 : vector<8x128xf32>
    %126 = vector.broadcast %32 : f32 to vector<8x128xf32>
    %127 = arith.addf %37, %126 : vector<8x128xf32>
    %128 = math.absf %127 : vector<8x128xf32>
    %129 = vector.broadcast %16 : f32 to vector<8x128xf32>
    %130 = arith.mulf %129, %128 : vector<8x128xf32>
    %131 = arith.addf %125, %130 : vector<8x128xf32>
    %132 = vector.broadcast %33 : f32 to vector<8x128xf32>
    %133 = arith.addf %37, %132 : vector<8x128xf32>
    %134 = math.absf %133 : vector<8x128xf32>
    %135 = vector.broadcast %17 : f32 to vector<8x128xf32>
    %136 = arith.mulf %135, %134 : vector<8x128xf32>
    %137 = arith.addf %131, %136 : vector<8x128xf32>
    %cst = arith.constant 0.000000e+00 : f32
    %138 = vector.broadcast %cst : f32 to vector<8x128xf32>
    %139 = arith.subf %138, %137 : vector<8x128xf32>
    %140 = math.exp %139 : vector<8x128xf32>
    %cst_1 = arith.constant 1.000000e+00 : f32
    %141 = vector.broadcast %cst_1 : f32 to vector<8x128xf32>
    %142 = arith.addf %141, %140 : vector<8x128xf32>
    %143 = tpu.reciprocal %142 {approx = true} : vector<8x128xf32> -> vector<8x128xf32>
    %144 = arith.index_cast %35 : i32 to index
    %c0_2 = arith.constant 0 : index
    %145 = vector.load %arg3[%144, %c0_2] : memref<8x128xf32, #tpu.memory_space<vmem>>, vector<8x128xf32>
    tpu.vector_store %arg3[%144, %c0_2], %143 {strides = array<i32>} : memref<8x128xf32, #tpu.memory_space<vmem>>, vector<8x128xf32>,
    %c1_i32 = arith.constant 1 : i32
    return
  }
  func.func @transform_0(%arg0: i32) -> (i32, i32) {
    %c0_i32 = arith.constant 0 : i32
    %c0_i32_0 = arith.constant 0 : i32
    return %arg0, %c0_i32 : i32, i32
  }
  func.func @transform_1(%arg0: i32) -> i32 {
    %c0_i32 = arith.constant 0 : i32
    %c0_i32_0 = arith.constant 0 : i32
    return %c0_i32 : i32
  }
  func.func @transform_2(%arg0: i32) -> (i32, i32) {
    %c0_i32 = arith.constant 0 : i32
    %c0_i32_0 = arith.constant 0 : i32
    return %arg0, %c0_i32 : i32, i32
  }
}

</mosaic_0001>

<bundles_post_ra>
// kernel: tpu_custom_call.1
= control target key start
LH: loop header
LB: loop body
LE: loop exit
PB: predicated region body
PF: predicated region fallthrough
CT: control target
= control target key end

     0   :  { %7 = vsyncpa [#allocation3], 0  ;;  %s427_s0 = inlined_call_operand.hbm [shape: f32[3,128], index: 0, kind: input, shape index: {}]   ;;  %s428_s1 = inlined_call_operand.vmem [shape: f32[34], index: 1, kind: input, shape index: {}]   ;;  %s429_s2 = inlined_call_operand.hbm [shape: f32[3,128], index: 2, kind: output, shape index: {}]  }
   0x1   :  { %8 = vsyncpa [#allocation5], 0 }
   0x2   :  { %9 = vsyncpa [#allocation4], 0 }
   0x3   :  { %14 = vsyncadd [#allocation3], 64  ;;  %s298_s9 = smov [#allocation2]   ;;  %s28_s13 = sshll.u32 %s428_s1, 4  ;;  %s29_s13 = int_to_ptr.vmem [resolvable:$true] %s28_s13 }
   0x4   :  { %s15_s10 = sshll.u32 %s298_s9, 4  ;;  %s16_s10 = int_to_ptr.vmem [resolvable:$true] %s15_s10 }
   0x5   :  { %s248_s14 = scalar_lea.vmem %s16_s10, 64  ;;  %s252_s15 = scalar_lea.vmem %s16_s10, 128 }
   0x6   :  { %p249_p0 = scmp.ne.s32.totalorder %s16_s10, %s248_s14  ;;  %p253_p1 = scmp.lt.s32.totalorder %s16_s10, %s16_s10 }
   0x7   :  { %p254_p2 = scmp.lt.s32.totalorder %s252_s15, %s248_s14 }
   0x9   :  { %p255_p3 = por %p254_p2, %p253_p1 }
   0xb   :  { %p256_p4 = pnand %p255_p3, %p249_p0 }
   0xd   :  { %259 = shalt.err (!%p256_p4)
}
   0xe   :  { %s299_s16 = smov 64   ;;  %s300_s17 = smov 4  }
   0xf   :  { %21 = dma.hbm_to_vmem [thread:$0]  %s427_s0, 64, %s16_s10, [#allocation3], %s299_s16, %s299_s16, %s300_s17  }
  0x10   :  { %s260_s20 = scalar_lea.vmem %s29_s13, 16  ;;  %p265_p6 = scmp.lt.s32.totalorder %s29_s13, %s29_s13 }
  0x11   :  { %p261_p5 = scmp.ne.s32.totalorder %s29_s13, %s260_s20  ;;  %p266_p7 = scmp.lt.s32.totalorder %s260_s20, %s260_s20 }
  0x13   :  { %p267_p8 = por %p266_p7, %p265_p6 }
  0x15   :  { %p268_p9 = pnand %p267_p8, %p261_p5 }
  0x17   :  { %271 = shalt.err (!%p268_p9)
}
  0x18   :  { %s301_s1 = smov [#allocation6]  }
  0x19   :  { %31 = dma.vmem_to_smem %s29_s13, 16, %s301_s1, [#allocation5]  }
  0x1a   :  { %292 = dma.done.wait [#allocation3], 128  }
  0x1b   :  { %293 = vsyncadd [#allocation3], 4294967168 }
  0x1c   :  { %294 = dma.done.wait [#allocation5], 16  }
  0x1d   :  { %295 = vsyncadd [#allocation5], 4294967280 }
  0x1e   :  { %38 = sfence }
  0x1f   :  { %s39_s21 = sld [smem:[#allocation6]]  ;;  %v341_v1 = vld [vmem:[#allocation2] sm:$0xff] }
  0x20   :  { %s198_s22 = sld [smem:[#allocation6 + $0x1]] }
  0x21   :  { %s327_s23 = sld [smem:[#allocation6 + $0x2]] }
  0x22   :  { %s329_s0 = sld [smem:[#allocation6 + $0x3]] }
  0x23   :  { %s331_s24 = sld [smem:[#allocation6 + $0x4]] }
  0x24   :  { %s333_s25 = sld [smem:[#allocation6 + $0x5]] }
  0x25   :  { %s335_s26 = sld [smem:[#allocation6 + $0x6]]  ;;  %v74_v0 = vstv %s39_s21 }
  0x26   :  { %s337_s27 = sld [smem:[#allocation6 + $0x7]]  ;;  %v75_v2 = vmul.f32 %v74_v0, %v341_v1  ;;  %v76_v3 = vstv %s198_s22 }
  0x27   :  { %s339_s28 = sld [smem:[#allocation6 + $0x8]]  ;;  %v81_v6 = vstv %s327_s23 }
  0x28   :  { %s215_s29 = sld [smem:[#allocation6 + $0x12]]  ;;  %v77_v8 = vadd.f32 %v76_v3, %v75_v2  ;;  %v87_v10 = vstv %s329_s0 }
  0x29   :  { %s216_s30 = sld [smem:[#allocation6 + $0x13]]  ;;  %v93_v14 = vstv %s331_s24 }
  0x2a   :  { %s217_s3 = sld [smem:[#allocation6 + $0x14]]  ;;  %v99_v18 = vstv %s333_s25 }
  0x2b   :  { %s218_s4 = sld [smem:[#allocation6 + $0x15]]  ;;  %v105_v32 = vstv %s335_s26 }
  0x2c   :  { %s219_s5 = sld [smem:[#allocation6 + $0x16]]  ;;  %v111_v39 = vstv %s337_s27 }
  0x2d   :  { %s344_s6 = sld [smem:[#allocation6 + $0x17]]  ;;  %v117_v45 = vstv %s339_s28 }
  0x2e   :  { %s346_s7 = sld [smem:[#allocation6 + $0x18]]  ;;  %v78_v4 = vstv %s215_s29 }
  0x2f   :  { %s348_s8 = sld [smem:[#allocation6 + $0x19]]  ;;  %v79_v5 = vadd.f32 %v78_v4, %v341_v1  ;;  %v84_v7 = vstv %s216_s30 }
  0x30   :  { %s352_s9 = sld [smem:[#allocation6 + $0x1a]]  ;;  %v85_v9 = vadd.f32 %v84_v7, %v341_v1  ;;  %v90_v11 = vstv %s217_s3 }
  0x31   :  { %s356_s10 = sld [smem:[#allocation6 + $0x1b]]  ;;  %v80_v12 = vand.u32 2147483647, %v79_v5  ;;  %v91_v13 = vadd.f32 %v90_v11, %v341_v1  ;;  %v96_v15 = vstv %s218_s4 }
  0x32   :  { %s360_s11 = sld [smem:[#allocation6 + $0x1c]]  ;;  %v86_v16 = vand.u32 2147483647, %v85_v9  ;;  %v97_v17 = vadd.f32 %v96_v15, %v341_v1  ;;  %v102_v19 = vstv %s219_s5 }
  0x33   :  { %s364_s12 = sld [smem:[#allocation6 + $0x9]]  ;;  %v82_v20 = vmul.f32 %v81_v6, %v80_v12  ;;  %v92_v21 = vand.u32 2147483647, %v91_v13  ;;  %v103_v22 = vadd.f32 %v102_v19, %v341_v1  ;;  %v108_v23 = vstv %s344_s6 }
  0x34   :  { %s368_s13 = sld [smem:[#allocation6 + $0x1d]]  ;;  %v88_v24 = vmul.f32 %v87_v10, %v86_v16  ;;  %v98_v25 = vand.u32 2147483647, %v97_v17  ;;  %v109_v26 = vadd.f32 %v108_v23, %v341_v1  ;;  %v114_v27 = vstv %s346_s7 }
  0x35   :  { %s372_s14 = sld [smem:[#allocation6 + $0xa]]  ;;  %v83_v28 = vadd.f32 %v82_v20, %v77_v8  ;;  %v94_v29 = vmul.f32 %v93_v14, %v92_v21  ;;  %v104_v30 = vand.u32 2147483647, %v103_v22  ;;  %v115_v31 = vadd.f32 %v114_v27, %v341_v1 }
  0x36   :  { %s375_s15 = sld [smem:[#allocation6 + $0x1e]]  ;;  %v120_v33 = vstv %s348_s8  ;;  %v126_v34 = vstv %s352_s9  ;;  %v100_v36 = vmul.f32 %v99_v18, %v98_v25  ;;  %v110_v37 = vand.u32 2147483647, %v109_v26 }
  0x37   :  { %s380_s18 = sld [smem:[#allocation6 + $0xb]]  ;;  %v89_v35 = vadd.f32 %v88_v24, %v83_v28  ;;  %v121_v38 = vadd.f32 %v120_v33, %v341_v1  ;;  %v132_v40 = vstv %s356_s10  ;;  %v106_v42 = vmul.f32 %v105_v32, %v104_v30 }
  0x38   :  { %s383_s19 = sld [smem:[#allocation6 + $0x1f]]  ;;  %v116_v43 = vand.u32 2147483647, %v115_v31  ;;  %v127_v44 = vadd.f32 %v126_v34, %v341_v1  ;;  %v138_v46 = vstv %s360_s11  ;;  %v112_v48 = vmul.f32 %v111_v39, %v110_v37 }
  0x39   :  { %s387_s20 = sld [smem:[#allocation6 + $0xc]]  ;;  %v95_v41 = vadd.f32 %v94_v29, %v89_v35  ;;  %v122_v49 = vand.u32 2147483647, %v121_v38  ;;  %v133_v50 = vadd.f32 %v132_v40, %v341_v1  ;;  %v123_v51 = vstv %s364_s12 }
  0x3a   :  { %s390_s1 = sld [smem:[#allocation6 + $0x20]]  ;;  %v144_v52 = vstv %s368_s13  ;;  %v118_v54 = vmul.f32 %v117_v45, %v116_v43  ;;  %v128_v55 = vand.u32 2147483647, %v127_v44  ;;  %v139_v56 = vadd.f32 %v138_v46, %v341_v1 }
  0x3b   :  { %s394_s21 = sld [smem:[#allocation6 + $0xd]]  ;;  %v101_v47 = vadd.f32 %v100_v36, %v95_v41  ;;  %v129_v57 = vstv %s372_s14  ;;  %v124_v60 = vmul.f32 %v123_v51, %v122_v49  ;;  %v134_v61 = vand.u32 2147483647, %v133_v50 }
  0x3c   :  { %s397_s22 = sld [smem:[#allocation6 + $0x21]]  ;;  %v150_v58 = vstv %s375_s15  ;;  %v145_v62 = vadd.f32 %v144_v52, %v341_v1  ;;  %v130_v3 = vmul.f32 %v129_v57, %v128_v55  ;;  %v140_v4 = vand.u32 2147483647, %v139_v56 }
  0x3d   :  { %v107_v53 = vadd.f32 %v106_v42, %v101_v47  ;;  %s402_s23 = sld [smem:[#allocation6 + $0xe]]  ;;  %v135_v63 = vstv %s380_s18  ;;  %v151_v5 = vadd.f32 %v150_v58, %v341_v1 }
  0x3e   :  { %s407_s0 = sld [smem:[#allocation6 + $0xf]]  ;;  %v156_v0 = vstv %s383_s19  ;;  %v136_v9 = vmul.f32 %v135_v63, %v134_v61  ;;  %v146_v10 = vand.u32 2147483647, %v145_v62 }
  0x3f   :  { %v113_v59 = vadd.f32 %v112_v48, %v107_v53  ;;  %s213_s24 = sld [smem:[#allocation6 + $0x10]]  ;;  %v141_v6 = vstv %s387_s20  ;;  %v157_v11 = vadd.f32 %v156_v0, %v341_v1  ;;  %v152_v16 = vand.u32 2147483647, %v151_v5 }
  0x40   :  { %v162_v7 = vstv %s390_s1  ;;  %s214_s25 = sld [smem:[#allocation6 + $0x11]]  ;;  %v142_v15 = vmul.f32 %v141_v6, %v140_v4 }
  0x41   :  { %v119_v2 = vadd.f32 %v118_v54, %v113_v59  ;;  %v147_v12 = vstv %s394_s21  ;;  %v163_v17 = vadd.f32 %v162_v7, %v341_v1  ;;  %v158_v21 = vand.u32 2147483647, %v157_v11 }
  0x42   :  { %v168_v13 = vstv %s397_s22  ;;  %v148_v20 = vmul.f32 %v147_v12, %v146_v10 }
  0x43   :  { %v125_v8 = vadd.f32 %v124_v60, %v119_v2  ;;  %v153_v18 = vstv %s402_s23  ;;  %v169_v22 = vadd.f32 %v168_v13, %v341_v1  ;;  %v164_v26 = vand.u32 2147483647, %v163_v17 }
  0x44   :  { %v159_v23 = vstv %s407_s0  ;;  %v154_v25 = vmul.f32 %v153_v18, %v152_v16 }
  0x45   :  { %v131_v14 = vadd.f32 %v130_v3, %v125_v8  ;;  %v165_v27 = vstv %s213_s24  ;;  %v160_v29 = vmul.f32 %v159_v23, %v158_v21  ;;  %v170_v30 = vand.u32 2147483647, %v169_v22 }
  0x46   :  { %v171_v31 = vstv %s214_s25  ;;  %v166_v33 = vmul.f32 %v165_v27, %v164_v26 }
  0x47   :  { %v137_v19 = vadd.f32 %v136_v9, %v131_v14  ;;  %v172_v35 = vmul.f32 %v171_v31, %v170_v30 }
  0x49   :  { %v143_v24 = vadd.f32 %v142_v15, %v137_v19 }
  0x4b   :  { %v149_v28 = vadd.f32 %v148_v20, %v143_v24 }
  0x4d   :  { %v155_v32 = vadd.f32 %v154_v25, %v149_v28 }
  0x4f   :  { %v161_v34 = vadd.f32 %v160_v29, %v155_v32 }
  0x51   :  { %v167_v36 = vadd.f32 %v166_v33, %v161_v34 }
  0x53   :  { %v173_v37 = vadd.f32 %v172_v35, %v167_v36 }
  0x55   :  { %v174_v38 = vsub.f32 0.0, %v173_v37 }
  0x57   :  { %v175_v39 = vmul.f32 1.442695, %v174_v38 }
  0x59   :  { %236 = vpow2.f32 %v175_v39 }
  0x66   :  { %v237_v40 = vpop.eup %236 }
  0x67   :  { %v177_v1 = vadd.f32 1.0, %v237_v40 }
  0x69   :  { %238 = vrcp.f32 %v177_v1 }
  0x76   :  { %v239_v41 = vpop.eup %238 }
  0x77   :  { %179 = vst [vmem:[#allocation7] sm:$0xff] %v239_v41 }
  0x78   :  { %184 = vsyncadd [#allocation4], 64  ;;  %s302_s26 = smov [#allocation7]  }
  0x79   :  { %s185_s27 = sshll.u32 %s302_s26, 4  ;;  %s186_s27 = int_to_ptr.vmem [resolvable:$true] %s185_s27 }
  0x7a   :  { %s272_s28 = scalar_lea.vmem %s186_s27, 64  ;;  %s276_s29 = scalar_lea.vmem %s186_s27, 128 }
  0x7b   :  { %p273_p10 = scmp.ne.s32.totalorder %s186_s27, %s272_s28  ;;  %p277_p11 = scmp.lt.s32.totalorder %s186_s27, %s186_s27 }
  0x7c   :  { %p278_p12 = scmp.lt.s32.totalorder %s276_s29, %s272_s28 }
  0x7e   :  { %p279_p13 = por %p278_p12, %p277_p11 }
  0x80   :  { %p280_p0 = pnand %p279_p13, %p273_p10 }
  0x82   :  { %283 = shalt.err (!%p280_p0)
}
  0x83   :  { %191 = dma.vmem_to_hbm [thread:$0]  %s186_s27, 64, %s429_s2, [#allocation4], %s299_s16, %s299_s16, %s300_s17  }
  0x84   :  { %296 = dma.done.wait [#allocation4], 128  }
  0x85   :  { %297 = vsyncadd [#allocation4], 4294967168 }
  0x86   :  { %195 = vsyncpa [#allocation3], 1 }
  0x87   :  { %196 = vsyncpa [#allocation4], 1 }
  0x88   :  { %197 = vsyncpa [#allocation5], 1 }

</bundles_post_ra>
